<compile_context>
chip_gen: v5e
topology: v5e:2x2
jax: 0.10.0
libtpu: 0.0.40
codegen_flags: <defaults>
</compile_context>

<pallas_src>
import numpy as np

import jax
import jax.numpy as jnp
from jax.experimental import pallas as pl
from jax.experimental.pallas import tpu as pltpu

_LANE = 128
_TILE_BYTES = 4 << 20              # ~4 MiB x/out tiles (perf review: 2-4 MiB)
_VMEM_LIMIT_BYTES = 32 << 20       # explicit scoped-VMEM budget (safe on v5e/v6e/v7x)
_RAGGED_SAMPLE_VMEM_CAP = 2 << 20  # padded per-sample cap for the no-pad ragged path


def _drop_path_kernel(x_ref, s_ref, o_ref):
    """o = x * scale[sample].  Grid axis 0 is always the sample index.

    x_ref/o_ref: one VMEM tile of a single sample; s_ref: (b,) float32 in SMEM.
    """
    s = s_ref[pl.program_id(0)]                      # scalar read from SMEM
    o_ref[...] = (x_ref[...] * s).astype(o_ref.dtype)


def _tiled_lane_path(x3, scale):
    """Lane-aligned fast path.  x3: (b, r, 128) view of x; scale: (b,) f32."""
    b, r, _ = x3.shape
    itemsize = np.dtype(x3.dtype).itemsize
    rows_target = max(8, _TILE_BYTES // (_LANE * itemsize))

    if r <= rows_target:
        rows_blk = r                 # full-extent dim: no (8,128) constraint
        if b == 1 and r >= 16:
            # Never a single un-pipelined block (and give v7x's 2nd core work).
            rows_blk = ((pl.cdiv(r, 2) + 7) // 8) * 8
    else:
        rows_blk = (rows_target // 8) * 8
    nt = pl.cdiv(r, rows_blk)
    # NOTE: when r % rows_blk != 0 the last block reads past the end of the
    # sample (garbage rows); Pallas masks the out-of-bounds writes, so this is
    # correct and only the tail tile wastes a little bandwidth.

    tile_spec = pl.BlockSpec((None, rows_blk, _LANE), lambda i, j: (i, j, 0))
    return pl.pallas_call(
        _drop_path_kernel,
        out_shape=jax.ShapeDtypeStruct(x3.shape, x3.dtype),
        grid=(b, nt),
        in_specs=[tile_spec,
                  pl.BlockSpec(memory_space=pltpu.MemorySpace.SMEM)],
        out_specs=pl.BlockSpec((None, rows_blk, _LANE), lambda i, j: (i, j, 0)),
        compiler_params=pltpu.CompilerParams(
            dimension_semantics=("parallel", "parallel"),
            vmem_limit_bytes=_VMEM_LIMIT_BYTES),
    )(x3, scale)


def _per_sample_path(xr, scale):
    """Ragged path: one full sample per grid step.  xr: (b, *sample_dims)."""
    b = xr.shape[0]
    nd = xr.ndim - 1
    block = (None,) + xr.shape[1:]   # trailing dims == full dims -> no (8,128) rule
    idx = lambda i: (i,) + (0,) * nd
    return pl.pallas_call(
        _drop_path_kernel,
        out_shape=jax.ShapeDtypeStruct(xr.shape, xr.dtype),
        grid=(b,),
        in_specs=[pl.BlockSpec(block, idx),
                  pl.BlockSpec(memory_space=pltpu.MemorySpace.SMEM)],
        out_specs=pl.BlockSpec(block, idx),
        compiler_params=pltpu.CompilerParams(
            dimension_semantics=("parallel",),
            vmem_limit_bytes=_VMEM_LIMIT_BYTES),
    )(xr, scale)


def drop_path(x, key, drop_prob: float = 0.0, scale_by_keep: bool = True,
              training: bool = True):
    """Pallas implementation of timm-style DropPath (matches _DropPath.forward).

    Identity when drop_prob == 0 or not training; otherwise each sample is kept
    with prob keep_prob and (optionally) scaled by 1/keep_prob.
    """
    if drop_prob == 0.0 or not training:
        return x

    keep_prob = 1.0 - drop_prob
    orig_shape = x.shape
    b = orig_shape[0]
    m = int(np.prod(orig_shape[1:])) if x.ndim > 1 else 1
    itemsize = np.dtype(x.dtype).itemsize

    # Per-sample Bernoulli keep mask, quantized in the input dtype to match
    # PyTorch/timm semantics (random_tensor is created and divided in
    # inputs.dtype), then widened exactly to f32 for 32-bit SMEM scalars.
    mask = jax.random.bernoulli(key, p=keep_prob, shape=(b,)).astype(x.dtype)
    if keep_prob > 0.0 and scale_by_keep:
        mask = mask / jnp.asarray(keep_prob, dtype=x.dtype)
    scale = mask.astype(jnp.float32)

    if m % _LANE == 0:
        # Common conv case: per-sample size is lane aligned; reshape is free.
        r = m // _LANE
        out = _tiled_lane_path(x.reshape(b, r, _LANE), scale)
        return out.reshape(orig_shape)

    # Ragged per-sample size: one full sample per grid step, block trailing
    # dims equal to the full array dims -> no jnp.pad/slice HBM round trip.
    sample_shape = orig_shape[1:] if x.ndim >= 3 else (1, m)
    lead = int(np.prod(sample_shape[:-2])) if len(sample_shape) > 2 else 1
    padded_bytes = (lead
                    * (-(-sample_shape[-2] // 8) * 8)
                    * (-(-sample_shape[-1] // _LANE) * _LANE)
                    * itemsize)
    if padded_bytes <= _RAGGED_SAMPLE_VMEM_CAP:
        out = _per_sample_path(x.reshape((b,) + tuple(sample_shape)), scale)
        return out.reshape(orig_shape)

    # Rare ragged-AND-huge samples: lane-pad fallback.
    # TODO(synk): replace with an in-kernel masked tail store to avoid the
    # pad/slice HBM round trip on this path as well.
    pad = (-m) % _LANE
    xf = jnp.pad(x.reshape(b, m), ((0, 0), (0, pad)))
    r = (m + pad) // _LANE
    out = _tiled_lane_path(xf.reshape(b, r, _LANE), scale)
    return out.reshape(b, m + pad)[:, :m].reshape(orig_shape)


if __name__ == "__main__":
    key = jax.random.PRNGKey(0)
    k_x, k_mask = jax.random.split(key)

    drop_prob = 0.5
    keep_prob = 1.0 - drop_prob

    def check(x, out, rtol=1e-5, atol=1e-5):
        assert out.shape == x.shape and out.dtype == x.dtype
        out_np = np.asarray(out).astype(np.float32)
        x_np = np.asarray(x).astype(np.float32)
        # Each sample must be either all-zero (dropped) or x[b]/keep_prob.
        for bi in range(x.shape[0]):
            dropped = np.allclose(out_np[bi], 0.0, atol=atol)
            kept = np.allclose(out_np[bi], x_np[bi] / keep_prob, rtol=rtol, atol=atol)
            assert dropped or kept, f"sample {bi} neither dropped nor kept"

    # Primary small NCHW case (C*H*W = 1024, lane-aligned tiled path).
    x = jax.random.normal(k_x, (2, 4, 16, 16), dtype=jnp.float32)
    out = jax.block_until_ready(
        drop_path(x, k_mask, drop_prob=drop_prob, training=True))
    check(x, out)

    # Ragged per-sample size (C*H*W = 300) -> per-sample full-block path (no pad).
    x_r = jax.random.normal(k_x, (2, 3, 10, 10), dtype=jnp.float32)
    out_r = jax.block_until_ready(
        drop_path(x_r, k_mask, drop_prob=drop_prob, training=True))
    check(x_r, out_r)

    # bf16 case large enough to exercise multiple row-tiles per sample
    # (per-sample 5 MiB > 4 MiB tile) and keep bf16 packed end-to-end.
    x_l = jax.random.normal(k_x, (2, 40, 256, 256), dtype=jnp.bfloat16)
    out_l = jax.block_until_ready(
        drop_path(x_l, k_mask, drop_prob=drop_prob, training=True))
    check(x_l, out_l, rtol=1e-2, atol=1e-2)

    # batch == 1: exercises the anti-degenerate-grid split (>= 2 pipelined steps).
    x_b1 = jax.random.normal(k_x, (1, 4, 256, 256), dtype=jnp.float32)
    out_b1 = jax.block_until_ready(
        drop_path(x_b1, k_mask, drop_prob=drop_prob, training=True))
    check(x_b1, out_b1)

    # Identity paths (eval mode / drop_prob == 0).
    x_np = np.asarray(x)
    out_eval = jax.block_until_ready(
        drop_path(x, k_mask, drop_prob=drop_prob, training=False))
    assert np.array_equal(np.asarray(out_eval), x_np)
    out_zero = jax.block_until_ready(
        drop_path(x, k_mask, drop_prob=0.0, training=True))
    assert np.array_equal(np.asarray(out_zero), x_np)

    print("KERNEL_OK")
</pallas_src>

<mosaic_0001>
module attributes {stable_mosaic.version = 11 : i64} {
  func.func @_drop_path_kernel(%arg0: i32, %arg1: i32, %arg2: memref<1x8x128xf32, #tpu.memory_space<vmem>>, %arg3: memref<2xf32, #tpu.memory_space<smem>>, %arg4: memref<1x8x128xf32, #tpu.memory_space<vmem>>) attributes {dimension_semantics = [#tpu.dimension_semantics<parallel>, #tpu.dimension_semantics<parallel>], iteration_bounds = array<i64: 2, 1>, scalar_prefetch = 0 : i64, scratch_operands = 0 : i64, tpu.core_type = #tpu.core_type<tc>, window_params = [{transform_indices = @transform_0, window_bounds = array<i64: 1, 8, 128>}, {transform_indices = @transform_1, window_bounds = array<i64: 2>}, {transform_indices = @transform_2, window_bounds = array<i64: 1, 8, 128>}]} {
    %0 = arith.index_cast %arg0 : i32 to index
    %1 = memref.load %arg3[%0] : memref<2xf32, #tpu.memory_space<smem>>
    %c0 = arith.constant 0 : index
    %c0_0 = arith.constant 0 : index
    %c0_1 = arith.constant 0 : index
    %2 = vector.load %arg2[%c0, %c0_0, %c0_1] : memref<1x8x128xf32, #tpu.memory_space<vmem>>, vector<1x8x128xf32>
    %3 = vector.shape_cast %2 : vector<1x8x128xf32> to vector<8x128xf32>
    %4 = vector.broadcast %1 : f32 to vector<8x128xf32>
    %5 = arith.mulf %3, %4 : vector<8x128xf32>
    %c0_2 = arith.constant 0 : index
    %c0_3 = arith.constant 0 : index
    %c0_4 = arith.constant 0 : index
    %6 = vector.load %arg4[%c0_2, %c0_3, %c0_4] : memref<1x8x128xf32, #tpu.memory_space<vmem>>, vector<1x8x128xf32>
    %7 = vector.shape_cast %6 : vector<1x8x128xf32> to vector<8x128xf32>
    %8 = vector.shape_cast %5 : vector<8x128xf32> to vector<1x8x128xf32>
    tpu.vector_store %arg4[%c0_2, %c0_3, %c0_4], %8 {strides = array<i32>} : memref<1x8x128xf32, #tpu.memory_space<vmem>>, vector<1x8x128xf32>,
    return
  }
  func.func @transform_0(%arg0: i32, %arg1: i32) -> (i32, i32, i32) {
    %c0_i32 = arith.constant 0 : i32
    %c0_i32_0 = arith.constant 0 : i32
    return %arg0, %arg1, %c0_i32 : i32, i32, i32
  }
  func.func @transform_1(%arg0: i32, %arg1: i32) -> i32 {
    %c0_i32 = arith.constant 0 : i32
    %c0_i32_0 = arith.constant 0 : i32
    return %c0_i32 : i32
  }
  func.func @transform_2(%arg0: i32, %arg1: i32) -> (i32, i32, i32) {
    %c0_i32 = arith.constant 0 : i32
    %c0_i32_0 = arith.constant 0 : i32
    return %arg0, %arg1, %c0_i32 : i32, i32, i32
  }
}

</mosaic_0001>

<bundles_post_ra>
// kernel: tpu_custom_call.1
= control target key start
LH: loop header
LB: loop body
LE: loop exit
PB: predicated region body
PF: predicated region fallthrough
CT: control target
= control target key end

     0   :  { %7 = vsyncpa [#allocation3], 0  ;;  %s689_s0 = inlined_call_operand.hbm [shape: f32[2,8,128], index: 0, kind: input, shape index: {}]   ;;  %s690_s1 = inlined_call_operand.hbm [shape: f32[2], index: 1, kind: input, shape index: {}]   ;;  %s691_s2 = inlined_call_operand.hbm [shape: f32[2,8,128], index: 2, kind: output, shape index: {}]  }
   0x1   :  { %9 = vsyncpa [#allocation3 + $0x1], 0 }
   0x2   :  { %10 = vsyncpa [#allocation5], 0 }
   0x3   :  { %11 = vsyncpa [#allocation4], 0 }
   0x4   :  { %13 = vsyncpa [#allocation4 + $0x1], 0  ;;  %s543_s9 = smov 0   ;;  %s545_s10 = smov 0  }
   0x5   :  { %s547_s11 = smov 0   ;;  %s549_s12 = smov 0  }
   0x6   :  { %s551_s13 = smov 0   ;;  %s553_s14 = smov 0  }
   0x7 LB: > { %s306_s15 = sadd.s32 4294967295, %s525_s14   ;;  %s307_s16 = sadd.s32 4294967294, %s525_s14   ;;  %s525_s14 = sphi %s553_s14, %s19_s14   ;;  %s521_s13 = sphi %s551_s13, %s703_s13   ;;  %s517_s12 = sphi %s549_s12, %s702_s12   ;;  %s513_s11 = sphi %s547_s11, %s701_s11   ;;  %s509_s10 = sphi %s545_s10, %s700_s10   ;;  %s505_s9 = sphi %s543_s9, %s699_s9  }
   0x8   : > { %p53_p0 = scmp.ne.s32.totalorder %s509_s10, %s505_s9  ;;  %p577_p1 = scmp.eq.s32.totalorder %s306_s15, 0 }
   0x9   : > { %p581_p2 = scmp.eq.s32.totalorder %s306_s15, 1  ;;  %p106_p3 = scmp.eq.s32.totalorder %s307_s16, 1 }
   0xa   : > { %p587_p4 = por %p577_p1, %p53_p0  ;;  %p308_p5 = scmp.ge.s32.totalorder %s525_s14, 1 }
   0xb   : > { %p592_p6 = por %p106_p3, %p53_p0  ;;  %p113_p7 = scmp.lt.s32.totalorder %s525_s14, 3 }
   0xc   : > { %s125_s23 = sshll.u32 %s690_s1, 4  ;;  %s31_s25 = sadd.s32 1, %s521_s13  ;;  %s126_s23 = int_to_ptr.hbm [resolvable:$true] %s125_s23 }
   0xd   : > { %p600_p8 = pnand %p308_p5, %p113_p7  ;;  %s40_s26 = sadd.s32 1, %s513_s11 }
   0xe   : > { %p33_p12 = scmp.ge.s32.totalorder %s31_s25, 2  ;;  %s527_s27 = smov [#allocation6]  }
   0xf   : > { %p329_p10 = pneg %p600_p8  ;;  %p47_p13 = scmp.ne.s32.totalorder %s513_s11, %s509_s10 }
  0x10   : > { %s705_s25 = smov (%p33_p12, %s31_s25), 0  ;;  %p48_p0 = scmp.eq.s32.totalorder %s525_s14, 0 }
  0x11   : > { %p330_p11 = pnand %p329_p10, %p577_p1  ;;  %s35_s28 = ssub.s32 %s521_s13, %s705_s25 }
  0x12   : > { %p342_p3 = scmp.lt.s32.totalorder %s525_s14, 2  ;;  %p38_p5 = scmp.eq.s32.totalorder %s35_s28, 0 }
  0x13   : > { %332 = dma.hbm_to_smem (!%p330_p11), %s126_s23, 16, %s527_s27, [#allocation5]  }
  0x14   : > { %p49_p7 = por %p48_p0, %p47_p13  ;;  %p621_p9 = por %p581_p2, %p47_p13 }
  0x15   : > { %s136_s30 = sand.u32 1, %s513_s11   ;;  %s312_s5 = sshll.u32 %s521_s13, 3 }
  0x16   : > { %s627_s3 = scalar_select %p38_p5, %s513_s11, %s40_s26  }
  0x17   : > { %s311_s4 = sshll.u32 %s136_s30, 3  ;;  %s145_s8 = scalar_lea.hbm %s689_s0, %s312_s5 }
  0x18   : > { %s140_s15 = scalar_lea.vmem [#allocation2], %s311_s4  ;;  %s147_s21 = sshll.u32 %s145_s8, 4  ;;  %s148_s21 = int_to_ptr.hbm [resolvable:$true] %s147_s21 }
  0x19   : > { %s149_s16 = sshll.u32 %s140_s15, 4  ;;  %p334_p10 = pnand %p342_p3, %p49_p7  ;;  %s150_s16 = int_to_ptr.vmem [resolvable:$true] %s149_s16 }
  0x1a   : > { %s137_s18 = scalar_lea.sflag [#allocation3], %s136_s30  ;;  %158 = sbr.rel (%p600_p8) target bundleno = 51 (0x33), region = 28 }
  0x1b   : > { %336 = dma.hbm_to_vmem [thread:$0]  (!%p334_p10), %s148_s21, 128, %s150_s16, %s137_s18  }
  0x1c   : > { %s638_s22 = sand.u32 (!%p600_p8), 1, %s509_s10  }
  0x1d   : > { %s314_s23 = sshll.u32 (!%p600_p8), %s638_s22, 3  ;;  %s161_s26 = scalar_lea.sflag (!%p600_p8), [#allocation3], %s638_s22 }
  0x1e   : > { %s164_s27 = scalar_lea.vmem (!%p600_p8), [#allocation2], %s314_s23 }
  0x1f   : > { %492 = dma.done.wait (%p587_p4), %s161_s26, 128  }
  0x20   : > { %494 = vsyncadd (%p587_p4), %s161_s26, 4294967168 }
  0x21   : > { %496 = dma.done.wait (%p577_p1), [#allocation5], 16  }
  0x22   : > { %498 = vsyncadd (%p577_p1), [#allocation5], 4294967280 }
  0x23   : > { %175 = sfence }
  0x24   : > { %s192_s24 = sld [smem:[#allocation6 + %s517_s12]]  ;;  %s318_s28 = sshll.u32 %s517_s12, 3  ;;  %v193_v0 = vld [vmem:[%s164_s27] sm:$0xff] }
  0x25   : > { %s209_s5 = scalar_lea.hbm %s691_s2, %s318_s28  ;;  %s191_s19 = scalar_lea.vmem [#allocation7], %s314_s23 }
  0x26   : > { %s211_s6 = sshll.u32 %s191_s19, 4  ;;  %s213_s7 = sshll.u32 %s209_s5, 4  ;;  %s212_s6 = int_to_ptr.vmem [resolvable:$true] %s211_s6  ;;  %s214_s7 = int_to_ptr.hbm [resolvable:$true] %s213_s7 }
  0x27   : > { %s198_s17 = scalar_lea.sflag [#allocation4], %s638_s22  ;;  %s453_s8 = sshra.s32 %s214_s7, 4  ;;  %s454_s8 = int_to_ptr.hbm [resolvable:$true] %s453_s8 }
  0x28   : > { %s455_s15 = scalar_lea.hbm %s454_s8, 8  ;;  %s459_s21 = scalar_lea.hbm %s691_s2, 16 }
  0x29   : > { %p456_p1 = scmp.ne.s32.totalorder %s454_s8, %s455_s15  ;;  %p460_p8 = scmp.lt.s32.totalorder %s454_s8, %s691_s2 }
  0x2a   : > { %v194_v1 = vstv %s192_s24  ;;  %p461_p11 = scmp.lt.s32.totalorder %s459_s21, %s455_s15 }
  0x2b   : > { %v195_v2 = vmul.f32 %v194_v1, %v193_v0  ;;  %p457_p2 = pnand %p456_p1, %p621_p9 }
  0x2c   : > { %p462_p12 = por %p461_p11, %p460_p8 }
  0x2d   : > { %196 = vst [vmem:[%s191_s19] sm:$0xff] %v195_v2  ;;  %p458_p4 = pneg %p457_p2 }
  0x2f   : > { %p463_p13 = pnand %p462_p12, %p458_p4 }
  0x31   : > { %466 = shalt.err (!%p463_p13)
}
  0x32   : > { %327 = dma.vmem_to_hbm [thread:$0]  (%p621_p9), %s212_s6, 128, %s214_s7, %s198_s17  }
  0x33 PF: > { %s225_s22 = sand.u32 1, %s505_s9   ;;  %p698_p0 = scmp.ge.s32.totalorder %s525_s14, 2 }
  0x34   : > { %s226_s26 = scalar_lea.sflag [#allocation4], %s225_s22 }
  0x35   : > { %p338_p3 = pnand %p698_p0, %p592_p6 }
  0x37   : > { %p339_p5 = pneg %p338_p3 }
  0x39   : > { %500 = dma.done.wait (%p339_p5), %s226_s26, 128  }
  0x3a   : > { %502 = vsyncadd (%p339_p5), %s226_s26, 4294967168  ;;  %s19_s14 = sadd.s32 1, %s525_s14   ;;  %s699_s9 = smov %s509_s10 }
  0x3b   : > { %p16_p7 = scmp.ge.s32.totalorder %s19_s14, 4   ;;  %s700_s10 = smov %s513_s11 }
  0x3c   : > { %s701_s11 = smov %s627_s3  ;;  %s702_s12 = smov %s521_s13 }
  0x3d   : > { %s703_s13 = smov %s705_s25  ;;  %18 = sbr.rel (!%p16_p7) target bundleno = 7 (0x7), region = 78 }
  0x42   :  { %232 = vsyncpa [#allocation3], 1 }
  0x43   :  { %234 = vsyncpa [#allocation3 + $0x1], 1 }
  0x44   :  { %235 = vsyncpa [#allocation4], 1 }
  0x45   :  { %237 = vsyncpa [#allocation4 + $0x1], 1 }
  0x46   :  { %238 = vsyncpa [#allocation5], 1 }
  0x47   :  { %240 = vsyncpa [#allocation5 + $0x1], 1 }

</bundles_post_ra>
